<compile_context>
chip_gen: v7x
topology: tpu7x:2x2x1
jax: 0.10.0
libtpu: 0.0.40
codegen_flags: <defaults>
</compile_context>

<pallas_src>
import math

import jax
import jax.numpy as jnp
from jax import lax
from jax.experimental import pallas as pl
from jax.experimental.pallas import tpu as pltpu


def mlp_kernel(x_ref, w1_ref, b1_ref, w2_ref, b2_ref, o_ref):
    # x_ref : (TB, F_pad)      bf16
    # w1_ref: (H_pad, F_pad)   bf16   PyTorch (out, in) layout
    # b1_ref: (1, H_pad)       f32
    # w2_ref: (C_pad, H_pad)   bf16   PyTorch (out, in) layout
    # b2_ref: (1, C_pad)       f32
    # o_ref : (TB, C_pad)      f32    lane-dense (128-wide) output tile

    # Hidden layer: contract on in-features (axis 1 of both operands) -> x @ w1.T
    h = lax.dot_general(
        x_ref[...], w1_ref[...],
        dimension_numbers=(((1,), (1,)), ((), ())),
        preferred_element_type=jnp.float32,
    )
    h = h + b1_ref[...]
    # Sigmoid: exp on EUP, approx reciprocal on EUP -> no VPU divide.
    h = pl.reciprocal(1.0 + jnp.exp(-h), approx=True)

    # Output layer: h @ w2.T (bf16 MXU inputs, f32 accumulation). Padded hidden
    # columns of w2 are zero, so the sigmoid(0)=0.5 values in padded hidden
    # lanes contribute nothing.
    logits = lax.dot_general(
        h.astype(jnp.bfloat16), w2_ref[...],
        dimension_numbers=(((1,), (1,)), ((), ())),
        preferred_element_type=jnp.float32,
    )
    o_ref[...] = (logits + b2_ref[...]).astype(o_ref.dtype)


def _round_up(x, m):
    return (x + m - 1) // m * m


def mlp_forward(x_nchw, w1, b1, w2, b2, *, batch_tile=None):
    """Forward pass of the PyTorch MLP.

    x_nchw: (N, C, H, W) float32
    w1: (num_hidden, num_features)  PyTorch Linear layout (out, in)
    b1: (num_hidden,)
    w2: (num_classes, num_hidden)
    b2: (num_classes,)
    returns: (N, num_classes) float32 logits
    """
    n = x_nchw.shape[0]
    num_features = math.prod(x_nchw.shape[1:])   # static Python int, no device op
    num_hidden = w1.shape[0]
    num_classes = w2.shape[0]

    LANE = 128   # vreg lane width
    SUB = 16     # bf16 sublane packing (also a multiple of the f32 8-row tile)

    f_pad = _round_up(num_features, LANE)
    h_pad = _round_up(num_hidden, LANE)
    c_pad = _round_up(num_classes, LANE)

    # Batch tile: 128 rows for real batches, otherwise the smallest aligned tile.
    if batch_tile is None:
        batch_tile = 128 if n >= 256 else _round_up(n, SUB)
    tb = batch_tile
    b_pad = _round_up(n, tb)
    grid = (b_pad // tb,)

    # Flatten (torch.nn.Flatten on contiguous NCHW), zero-pad, cast to bf16 for
    # the MXU. Zero-padded feature/hidden columns contribute nothing.
    x2d = x_nchw.reshape(n, num_features).astype(jnp.float32)
    x2d = jnp.pad(x2d, ((0, b_pad - n), (0, f_pad - num_features)))
    x2d = x2d.astype(jnp.bfloat16)

    w1p = jnp.pad(jnp.asarray(w1, jnp.float32),
                  ((0, h_pad - num_hidden), (0, f_pad - num_features))
                  ).astype(jnp.bfloat16)
    w2p = jnp.pad(jnp.asarray(w2, jnp.float32),
                  ((0, c_pad - num_classes), (0, h_pad - num_hidden))
                  ).astype(jnp.bfloat16)
    b1p = jnp.pad(jnp.asarray(b1, jnp.float32),
                  (0, h_pad - num_hidden)).reshape(1, h_pad)
    b2p = jnp.pad(jnp.asarray(b2, jnp.float32),
                  (0, c_pad - num_classes)).reshape(1, c_pad)

    out = pl.pallas_call(
        mlp_kernel,
        out_shape=jax.ShapeDtypeStruct((b_pad, c_pad), jnp.float32),
        grid_spec=pltpu.PrefetchScalarGridSpec(
            num_scalar_prefetch=0,
            grid=grid,
            in_specs=[
                # x: tiled over batch (pipelined).
                pl.BlockSpec((tb, f_pad), lambda i: (i, 0)),
                # Weights/biases: constant index_map across the batch axis
                # -> fetched once, stay resident in VMEM.
                pl.BlockSpec((h_pad, f_pad), lambda i: (0, 0)),
                pl.BlockSpec((1, h_pad), lambda i: (0, 0)),
                pl.BlockSpec((c_pad, h_pad), lambda i: (0, 0)),
                pl.BlockSpec((1, c_pad), lambda i: (0, 0)),
            ],
            out_specs=pl.BlockSpec((tb, c_pad), lambda i: (i, 0)),
        ),
        compiler_params=pltpu.CompilerParams(
            # Batch tiles are independent -> shard across TCs on v7x megacore.
            dimension_semantics=("parallel",),
        ),
    )(x2d, w1p, b1p, w2p, b2p)

    # TODO(synk): for very large num_features add a K-tiling grid axis with an
    # f32 VMEM accumulator (and re-derive tiles against v7x's 64 MiB VMEM).
    return out[:n, :num_classes]


def reference_forward(x_nchw, w1, b1, w2, b2):
    """Pure-JAX f32 reference matching the PyTorch module semantics."""
    n = x_nchw.shape[0]
    x2d = x_nchw.reshape(n, -1).astype(jnp.float32)
    h = jax.nn.sigmoid(x2d @ w1.T + b1)
    return h @ w2.T + b2


if __name__ == "__main__":
    # Small shapes consistent with the module: image-like input flattened.
    batch, channels, spatial = 2, 4, 16
    num_features = channels * spatial * spatial   # 1024
    num_hidden = 32
    num_classes = 10

    key = jax.random.PRNGKey(0)
    kx, kw1, kb1, kw2, kb2 = jax.random.split(key, 5)

    x = jax.random.normal(kx, (batch, channels, spatial, spatial), jnp.float32)

    # Deterministic parameter init (uniform, roughly PyTorch Linear default scale).
    bound1 = 1.0 / (num_features ** 0.5)
    w1 = jax.random.uniform(kw1, (num_hidden, num_features), jnp.float32,
                            -bound1, bound1)
    b1 = jax.random.uniform(kb1, (num_hidden,), jnp.float32, -bound1, bound1)
    bound2 = 1.0 / (num_hidden ** 0.5)
    w2 = jax.random.uniform(kw2, (num_classes, num_hidden), jnp.float32,
                            -bound2, bound2)
    b2 = jax.random.uniform(kb2, (num_classes,), jnp.float32, -bound2, bound2)

    out = mlp_forward(x, w1, b1, w2, b2)
    out = jax.block_until_ready(out)

    ref = jax.block_until_ready(reference_forward(x, w1, b1, w2, b2))
    assert out.shape == (batch, num_classes)
    # bf16 MXU inputs with f32 accumulation -> small quantization error vs the
    # pure-f32 reference; tolerance sized accordingly.
    assert jnp.allclose(out, ref, atol=2e-2, rtol=2e-2), "mismatch vs reference"

    print("KERNEL_OK")
</pallas_src>

<mosaic_0001>
module attributes {stable_mosaic.version = 11 : i64} {
  func.func @mlp_kernel(%arg0: i32, %arg1: memref<16x1024xbf16, #tpu.memory_space<vmem>>, %arg2: memref<128x1024xbf16, #tpu.memory_space<vmem>>, %arg3: memref<1x128xf32, #tpu.memory_space<vmem>>, %arg4: memref<128x128xbf16, #tpu.memory_space<vmem>>, %arg5: memref<1x128xf32, #tpu.memory_space<vmem>>, %arg6: memref<16x128xf32, #tpu.memory_space<vmem>>) attributes {dimension_semantics = [#tpu.dimension_semantics<parallel>], iteration_bounds = array<i64: 1>, scalar_prefetch = 0 : i64, scratch_operands = 0 : i64, tpu.core_type = #tpu.core_type<tc>, window_params = [{transform_indices = @transform_0, window_bounds = array<i64: 16, 1024>}, {pipeline_mode = #tpu.pipeline_mode<synchronous>, transform_indices = @transform_1, window_bounds = array<i64: 128, 1024>}, {pipeline_mode = #tpu.pipeline_mode<synchronous>, transform_indices = @transform_2, window_bounds = array<i64: 1, 128>}, {pipeline_mode = #tpu.pipeline_mode<synchronous>, transform_indices = @transform_3, window_bounds = array<i64: 128, 128>}, {pipeline_mode = #tpu.pipeline_mode<synchronous>, transform_indices = @transform_4, window_bounds = array<i64: 1, 128>}, {transform_indices = @transform_5, window_bounds = array<i64: 16, 128>}]} {
    %c0 = arith.constant 0 : index
    %c0_0 = arith.constant 0 : index
    %0 = vector.load %arg1[%c0, %c0_0] : memref<16x1024xbf16, #tpu.memory_space<vmem>>, vector<16x1024xbf16>
    %c0_1 = arith.constant 0 : index
    %c0_2 = arith.constant 0 : index
    %1 = vector.load %arg2[%c0_1, %c0_2] : memref<128x1024xbf16, #tpu.memory_space<vmem>>, vector<128x1024xbf16>
    %cst = arith.constant dense<0.000000e+00> : vector<16x128xf32>
    %2 = tpu.matmul %0, %1, %cst {dimension_numbers = #tpu.dot_dimension_numbers<[1], [1], [0], [0], [0, 0, 1, 0], [], []>} : vector<16x1024xbf16>, vector<128x1024xbf16>, vector<16x128xf32> -> vector<16x128xf32>
    %c0_3 = arith.constant 0 : index
    %c0_4 = arith.constant 0 : index
    %3 = vector.load %arg3[%c0_3, %c0_4] : memref<1x128xf32, #tpu.memory_space<vmem>>, vector<1x128xf32>
    %4 = vector.broadcast %3 : vector<1x128xf32> to vector<16x128xf32>
    %5 = arith.addf %2, %4 : vector<16x128xf32>
    %cst_5 = arith.constant 0.000000e+00 : f32
    %6 = vector.broadcast %cst_5 : f32 to vector<16x128xf32>
    %7 = arith.subf %6, %5 : vector<16x128xf32>
    %8 = math.exp %7 : vector<16x128xf32>
    %cst_6 = arith.constant 1.000000e+00 : f32
    %9 = vector.broadcast %cst_6 : f32 to vector<16x128xf32>
    %10 = arith.addf %9, %8 : vector<16x128xf32>
    %11 = tpu.reciprocal %10 {approx = true} : vector<16x128xf32> -> vector<16x128xf32>
    %12 = arith.truncf %11 : vector<16x128xf32> to vector<16x128xbf16>
    %c0_7 = arith.constant 0 : index
    %c0_8 = arith.constant 0 : index
    %13 = vector.load %arg4[%c0_7, %c0_8] : memref<128x128xbf16, #tpu.memory_space<vmem>>, vector<128x128xbf16>
    %cst_9 = arith.constant dense<0.000000e+00> : vector<16x128xf32>
    %14 = tpu.matmul %12, %13, %cst_9 {dimension_numbers = #tpu.dot_dimension_numbers<[1], [1], [0], [0], [0, 0, 1, 0], [], []>} : vector<16x128xbf16>, vector<128x128xbf16>, vector<16x128xf32> -> vector<16x128xf32>
    %c0_10 = arith.constant 0 : index
    %c0_11 = arith.constant 0 : index
    %15 = vector.load %arg5[%c0_10, %c0_11] : memref<1x128xf32, #tpu.memory_space<vmem>>, vector<1x128xf32>
    %16 = vector.broadcast %15 : vector<1x128xf32> to vector<16x128xf32>
    %17 = arith.addf %14, %16 : vector<16x128xf32>
    %c0_12 = arith.constant 0 : index
    %c0_13 = arith.constant 0 : index
    %18 = vector.load %arg6[%c0_12, %c0_13] : memref<16x128xf32, #tpu.memory_space<vmem>>, vector<16x128xf32>
    tpu.vector_store %arg6[%c0_12, %c0_13], %17 {strides = array<i32>} : memref<16x128xf32, #tpu.memory_space<vmem>>, vector<16x128xf32>,
    return
  }
  func.func @transform_0(%arg0: i32) -> (i32, i32) {
    %c0_i32 = arith.constant 0 : i32
    %c0_i32_0 = arith.constant 0 : i32
    return %arg0, %c0_i32 : i32, i32
  }
  func.func @transform_1(%arg0: i32) -> (i32, i32) {
    %c0_i32 = arith.constant 0 : i32
    %c0_i32_0 = arith.constant 0 : i32
    %c0_i32_1 = arith.constant 0 : i32
    return %c0_i32, %c0_i32_0 : i32, i32
  }
  func.func @transform_2(%arg0: i32) -> (i32, i32) {
    %c0_i32 = arith.constant 0 : i32
    %c0_i32_0 = arith.constant 0 : i32
    %c0_i32_1 = arith.constant 0 : i32
    return %c0_i32, %c0_i32_0 : i32, i32
  }
  func.func @transform_3(%arg0: i32) -> (i32, i32) {
    %c0_i32 = arith.constant 0 : i32
    %c0_i32_0 = arith.constant 0 : i32
    %c0_i32_1 = arith.constant 0 : i32
    return %c0_i32, %c0_i32_0 : i32, i32
  }
  func.func @transform_4(%arg0: i32) -> (i32, i32) {
    %c0_i32 = arith.constant 0 : i32
    %c0_i32_0 = arith.constant 0 : i32
    %c0_i32_1 = arith.constant 0 : i32
    return %c0_i32, %c0_i32_0 : i32, i32
  }
  func.func @transform_5(%arg0: i32) -> (i32, i32) {
    %c0_i32 = arith.constant 0 : i32
    %c0_i32_0 = arith.constant 0 : i32
    return %arg0, %c0_i32 : i32, i32
  }
}

</mosaic_0001>

<bundles_post_ra>
// kernel: tpu_custom_call.1
= control target key start
LH: loop header
LB: loop body
LE: loop exit
PB: predicated region body
PF: predicated region fallthrough
CT: control target
= control target key end

     0   :  { %10 = vsyncpa [#allocation3], 0  ;;  %s1182_s0 = inlined_call_operand.hbm [shape: bf16[16,1024], index: 0, kind: input, shape index: {}]   ;;  %s1183_s1 = inlined_call_operand.hbm [shape: bf16[128,1024], index: 1, kind: input, shape index: {}]   ;;  %s1184_s2 = inlined_call_operand.vmem [shape: f32[1,128], index: 2, kind: input, shape index: {}]   ;;  %s1185_s3 = inlined_call_operand.hbm [shape: bf16[128,128], index: 3, kind: input, shape index: {}]   ;;  %s1186_s4 = inlined_call_operand.vmem [shape: f32[1,128], index: 4, kind: input, shape index: {}]   ;;  %s1187_s5 = inlined_call_operand.hbm [shape: f32[16,128], index: 5, kind: output, shape index: {}]  }
   0x1   :  { %11 = vsyncpa [#allocation6], 0 }
   0x2   :  { %12 = vsyncpa [#allocation4], 0  ;;  %s1054_s18 = smov [#allocation5]   ;;  %s1055_s20 = smov [#allocation2]  }
   0x3   :  { %s30_s19 = sshll.u32 %s1054_s18, 4  ;;  %s18_s21 = sshll.u32 %s1055_s20, 4  ;;  %s31_s19 = int_to_ptr.vmem [resolvable:$true] %s30_s19  ;;  %s1096_s21 = int_to_ptr.vmem [resolvable:$true] %s18_s21 }
   0x4   :  { %s960_s24 = scalar_lea.hbm %s1183_s1, 8192 }
   0x5   :  { %p961_p0 = scmp.ne.s32.totalorder %s1183_s1, %s960_s24  ;;  %p964_p1 = scmp.lt.u32.totalorder %s960_s24, %s1183_s1 }
   0x7   :  { %p966_p2 = pnand %p964_p1, %p961_p0 }
   0x9   :  { %969 = shalt.err (!%p966_p2)
}
   0xa   :  { %s970_s29 = scalar_lea.vmem %s31_s19, 8192  ;;  %p975_p4 = scmp.lt.s32.totalorder %s31_s19, %s31_s19 }
   0xb   :  { %p971_p3 = scmp.ne.s32.totalorder %s31_s19, %s970_s29  ;;  %p976_p5 = scmp.lt.s32.totalorder %s970_s29, %s970_s29 }
   0xd   :  { %p977_p6 = por %p976_p5, %p975_p4 }
   0xf   :  { %p978_p7 = pnand %p977_p6, %p971_p3 }
  0x11   :  { %981 = shalt.err (!%p978_p7)
}
  0x12   :  { %s1056_s30 = smov 512   ;;  %s1057_s6 = smov 32  }
  0x13   :  { %36 = dma.hbm_to_vmem [thread:$0]  %s1183_s1, 8192, %s31_s19, [#allocation6], %s1056_s30, %s1056_s30, %s1057_s6  }
  0x14   :  { %s982_s11 = scalar_lea.hbm %s1182_s0, 1024 }
  0x15   :  { %p983_p8 = scmp.ne.s32.totalorder %s1182_s0, %s982_s11  ;;  %p986_p9 = scmp.lt.u32.totalorder %s982_s11, %s1182_s0 }
  0x17   :  { %p988_p10 = pnand %p986_p9, %p983_p8 }
  0x19   :  { %991 = shalt.err (!%p988_p10)
}
  0x1a   :  { %s992_s16 = scalar_lea.vmem %s1096_s21, 1024  ;;  %p997_p12 = scmp.lt.s32.totalorder %s1096_s21, %s1096_s21 }
  0x1b   :  { %p993_p11 = scmp.ne.s32.totalorder %s1096_s21, %s992_s16  ;;  %p998_p13 = scmp.lt.s32.totalorder %s992_s16, %s992_s16 }
  0x1d   :  { %p999_p0 = por %p998_p13, %p997_p12 }
  0x1f   :  { %p1000_p1 = pnand %p999_p0, %p993_p11 }
  0x21   :  { %1003 = shalt.err (!%p1000_p1)
}
  0x22   :  { %24 = dma.hbm_to_vmem [thread:$0]  %s1182_s0, 1024, %s1096_s21, [#allocation3], %s1056_s30, %s1056_s30, %s1057_s6  }
  0x23   :  { %s1058_s18 = smov [#allocation7]   ;;  %s1004_s23 = scalar_lea.hbm %s1185_s3, 1024 }
  0x24   :  { %s44_s19 = sshll.u32 %s1058_s18, 4  ;;  %p1005_p2 = scmp.ne.s32.totalorder %s1185_s3, %s1004_s23  ;;  %s45_s19 = int_to_ptr.vmem [resolvable:$true] %s44_s19 }
  0x25   :  { %p1008_p3 = scmp.lt.u32.totalorder %s1004_s23, %s1185_s3 }
  0x27   :  { %p1010_p4 = pnand %p1008_p3, %p1005_p2 }
  0x29   :  { %1013 = shalt.err (!%p1010_p4)
}
  0x2a   :  { %s1014_s28 = scalar_lea.vmem %s45_s19, 1024  ;;  %p1019_p6 = scmp.lt.s32.totalorder %s45_s19, %s45_s19 }
  0x2b   :  { %p1015_p5 = scmp.ne.s32.totalorder %s45_s19, %s1014_s28  ;;  %p1020_p7 = scmp.lt.s32.totalorder %s1014_s28, %s1014_s28 }
  0x2d   :  { %p1021_p8 = por %p1020_p7, %p1019_p6 }
  0x2f   :  { %p1022_p9 = pnand %p1021_p8, %p1015_p5 }
  0x31   :  { %1025 = shalt.err (!%p1022_p9)
}
  0x32   :  { %s1059_s0 = smov 64   ;;  %s1060_s21 = smov 4  }
  0x33   :  { %50 = dma.hbm_to_vmem [thread:$0]  %s1185_s3, 1024, %s45_s19, [#allocation6], %s1059_s0, %s1059_s0, %s1060_s21  }
  0x34   :  { %1048 = dma.done.wait [#allocation3], 1024  }
  0x35   :  { %1049 = vsyncadd [#allocation3], 4294966272 }
  0x36   :  { %1050 = dma.done.wait [#allocation6], 9216  }
  0x37   :  { %1051 = vsyncadd [#allocation6], 4294958080  ;;  %v72_v0 = vld [vmem:[#allocation5 + $0x8] sm:$0xff]  ;;  %v71_v14 = vld [vmem:[#allocation5] sm:$0xff]  ;;  %vm1062_vm0 = vmmov 0   ;;  %s1063_s8 = smov [#allocation8]  }
  0x38   :  { %v76_v1 = vld [vmem:[#allocation5 + $0x28] sm:$0xff]  ;;  %v75_v15 = vld [vmem:[#allocation5 + $0x20] sm:$0xff]  ;;  %v73_v61 = vld [vmem:[#allocation5 + $0x10] sm:$0xff]  ;;  %s796_s9 = sshll.u32 %s1063_s8, 4  ;;  %s797_s9 = int_to_ptr.vmem [resolvable:$true] %s796_s9 }
  0x39   :  { %v80_v2 = vld [vmem:[#allocation5 + $0x48] sm:$0xff]  ;;  %v821_v3 = vcombine.high %v72_v0, %v76_v1  ;;  %v820_v4 = vcombine.low %v72_v0, %v76_v1  ;;  %v819_v16 = vcombine.high %v71_v14, %v75_v15  ;;  %v818_v17 = vcombine.low %v71_v14, %v75_v15  ;;  %v79_v18 = vld [vmem:[#allocation5 + $0x40] sm:$0xff]  ;;  %v77_v62 = vld [vmem:[#allocation5 + $0x30] sm:$0xff]  ;;  %s1026_s10 = scalar_lea.vmem %s797_s9, 256  ;;  %p1031_p11 = scmp.lt.s32.totalorder %s797_s9, %s797_s9 }
  0x3a   :  { %v84_v5 = vld [vmem:[#allocation5 + $0x68] sm:$0xff]  ;;  %v83_v19 = vld [vmem:[#allocation5 + $0x60] sm:$0xff]  ;;  %v823_v0 = vcombine.high %v73_v61, %v77_v62  ;;  %v822_v15 = vcombine.low %v73_v61, %v77_v62  ;;  %v98_v62 = vld [vmem:[#allocation5 + $0xd8] sm:$0xff]  ;;  %p1027_p10 = scmp.ne.s32.totalorder %s797_s9, %s1026_s10  ;;  %p1032_p12 = scmp.lt.s32.totalorder %s1026_s10, %s1026_s10 }
  0x3b   :  { %v829_v6 = vcombine.high %v80_v2, %v84_v5  ;;  %543 = vmatprep.subr.bf16.mxu0 %v821_v3  ;;  %v1139_v7 = vld [vmem:[#allocation2 + $0x8] sm:$0xff]  ;;  %v828_v12 = vcombine.low %v80_v2, %v84_v5  ;;  %502 = vmatprep.subr.bf16.mxu1 %v819_v16  ;;  %v827_v22 = vcombine.high %v79_v18, %v83_v19  ;;  %v87_v23 = vld [vmem:[#allocation5 + $0x80] sm:$0xff] }
  0x3c   :  { %544 = vmatpush1.bf16.xpose.msra.mxu0 %v820_v4  ;;  %v1141_v8 = vld [vmem:[#allocation2 + $0x28] sm:$0xff]  ;;  %503 = vmatpush1.bf16.xpose.msra.mxu1 %v818_v17  ;;  %v91_v24 = vld [vmem:[#allocation5 + $0xa0] sm:$0xff]  ;;  %v826_v27 = vcombine.low %v79_v18, %v83_v19  ;;  %v89_v19 = vld [vmem:[#allocation5 + $0x90] sm:$0xff]  ;;  %p1033_p13 = por %p1032_p12, %p1031_p11 }
  0x3d   :  { %545 = vmatprep.subr.bf16.mxu0 %v829_v6  ;;  %v88_v9 = vld [vmem:[#allocation5 + $0x88] sm:$0xff]  ;;  %v813_v11 = vcombine.high %v1139_v7, %v1141_v8  ;;  %504 = vmatprep.subr.bf16.mxu1 %v827_v22  ;;  %v835_v29 = vcombine.high %v87_v23, %v91_v24  ;;  %v95_v33 = vld [vmem:[#allocation5 + $0xc0] sm:$0xff]  ;;  %v834_v35 = vcombine.low %v87_v23, %v91_v24  ;;  %v1061_v22 = vmov 0.0   ;;  %v97_v24 = vld [vmem:[#allocation5 + $0xd0] sm:$0xff] }
  0x3e   :  { %v92_v10 = vld [vmem:[#allocation5 + $0xa8] sm:$0xff]  ;;  %v99_v34 = vld [vmem:[#allocation5 + $0xe0] sm:$0xff]  ;;  %v812_v14 = vcombine.low %v1139_v7, %v1141_v8  ;;  %p1034_p0 = pnand %p1033_p13, %p1027_p10 }
  0x3f   :  { %575 = vmatprep.mubr.bf16.mxu0 %v813_v11  ;;  %v837_v13 = vcombine.high %v88_v9, %v92_v10  ;;  %v96_v20 = vld [vmem:[#allocation5 + $0xc8] sm:$0xff]  ;;  %v836_v25 = vcombine.low %v88_v9, %v92_v10  ;;  %v843_v36 = vcombine.high %v95_v33, %v99_v34  ;;  %v103_v41 = vld [vmem:[#allocation5 + $0x100] sm:$0xff]  ;;  %v842_v43 = vcombine.low %v95_v33, %v99_v34  ;;  %v1145_v10 = vld [vmem:[#allocation2 + $0x10] sm:$0xff] }
  0x40   :  { %v100_v21 = vld [vmem:[#allocation5 + $0xe8] sm:$0xff]  ;;  %v107_v42 = vld [vmem:[#allocation5 + $0x120] sm:$0xff]  ;;  %v1147_v11 = vld [vmem:[#allocation2 + $0x30] sm:$0xff] }
  0x41   :  { %v845_v26 = vcombine.high %v96_v20, %v100_v21  ;;  %v104_v28 = vld [vmem:[#allocation5 + $0x108] sm:$0xff]  ;;  %v844_v31 = vcombine.low %v96_v20, %v100_v21  ;;  %v851_v44 = vcombine.high %v103_v41, %v107_v42  ;;  %v111_v49 = vld [vmem:[#allocation5 + $0x140] sm:$0xff]  ;;  %v850_v51 = vcombine.low %v103_v41, %v107_v42  ;;  %v93_v20 = vld [vmem:[#allocation5 + $0xb0] sm:$0xff] }
  0x42   :  { %v108_v30 = vld [vmem:[#allocation5 + $0x128] sm:$0xff]  ;;  %v115_v50 = vld [vmem:[#allocation5 + $0x160] sm:$0xff]  ;;  %v815_v16 = vcombine.high %v1145_v10, %v1147_v11  ;;  %v839_v7 = vcombine.high %v89_v19, %v93_v20  ;;  %v946_v33 = vld [vmem:[#allocation7 + $0x10] sm:$0xff]  }
  0x43   :  { %v853_v32 = vcombine.high %v104_v28, %v108_v30  ;;  %v112_v37 = vld [vmem:[#allocation5 + $0x148] sm:$0xff]  ;;  %v852_v39 = vcombine.low %v104_v28, %v108_v30  ;;  %v859_v52 = vcombine.high %v111_v49, %v115_v50  ;;  %v119_v57 = vld [vmem:[#allocation5 + $0x180] sm:$0xff]  ;;  %v858_v59 = vcombine.low %v111_v49, %v115_v50  ;;  %v109_v30 = vld [vmem:[#allocation5 + $0x130] sm:$0xff] }
  0x44   :  { %546 = vmatpush1.bf16.xpose.msra.mxu0 %v828_v12  ;;  %505 = vmatpush1.bf16.xpose.msra.mxu1 %v826_v27  ;;  %v116_v38 = vld [vmem:[#allocation5 + $0x168] sm:$0xff]  ;;  %v123_v58 = vld [vmem:[#allocation5 + $0x1a0] sm:$0xff]  ;;  %v81_v12 = vld [vmem:[#allocation5 + $0x50] sm:$0xff] }
  0x45   :  { %547 = vmatprep.subr.bf16.mxu0 %v837_v13  ;;  %506 = vmatprep.subr.bf16.mxu1 %v835_v29  ;;  %v861_v40 = vcombine.high %v112_v37, %v116_v38  ;;  %v120_v45 = vld [vmem:[#allocation5 + $0x188] sm:$0xff]  ;;  %v860_v47 = vcombine.low %v112_v37, %v116_v38  ;;  %v867_v60 = vcombine.high %v119_v57, %v123_v58  ;;  %v127_v1 = vld [vmem:[#allocation5 + $0x1c0] sm:$0xff]  ;;  %v85_v13 = vld [vmem:[#allocation5 + $0x70] sm:$0xff] }
  0x46   :  { %v124_v46 = vld [vmem:[#allocation5 + $0x1a8] sm:$0xff]  ;;  %v131_v2 = vld [vmem:[#allocation5 + $0x1e0] sm:$0xff]  ;;  %v866_v5 = vcombine.low %v119_v57, %v123_v58  ;;  %v831_v17 = vcombine.high %v81_v12, %v85_v13  ;;  %v830_v21 = vcombine.low %v81_v12, %v85_v13  ;;  %v105_v29 = vld [vmem:[#allocation5 + $0x110] sm:$0xff] }
  0x47   :  { %v869_v48 = vcombine.high %v120_v45, %v124_v46  ;;  %v128_v53 = vld [vmem:[#allocation5 + $0x1c8] sm:$0xff]  ;;  %v868_v55 = vcombine.low %v120_v45, %v124_v46  ;;  %v63_v3 = vld [vmem:[#allocation2] sm:$0xff]  ;;  %v875_v9 = vcombine.high %v127_v1, %v131_v2  ;;  %v874_v18 = vcombine.low %v127_v1, %v131_v2  ;;  %v113_v34 = vld [vmem:[#allocation5 + $0x150] sm:$0xff] }
  0x48   :  { %v132_v54 = vld [vmem:[#allocation5 + $0x1e8] sm:$0xff]  ;;  %v67_v4 = vld [vmem:[#allocation2 + $0x20] sm:$0xff]  ;;  %v121_v38 = vld [vmem:[#allocation5 + $0x190] sm:$0xff] }
  0x49   :  { %v877_v56 = vcombine.high %v128_v53, %v132_v54  ;;  %v876_v63 = vcombine.low %v128_v53, %v132_v54  ;;  %v811_v6 = vcombine.high %v63_v3, %v67_v4  ;;  %v810_v8 = vcombine.low %v63_v3, %v67_v4  ;;  %v944_v23 = vld [vmem:[#allocation7] sm:$0xff]   ;;  %v945_v28 = vld [vmem:[#allocation7 + $0x8] sm:$0xff]   ;;  %v129_v42 = vld [vmem:[#allocation5 + $0x1d0] sm:$0xff] }
  0x4a   :  { %v74_v46 = vld [vmem:[#allocation5 + $0x18] sm:$0xff]  ;;  %v814_v54 = vcombine.low %v1145_v10, %v1147_v11 }
  0x4b   :  { %534 = vmatprep.mubr.bf16.mxu1 %v811_v6  ;;  %v66_v50 = vld [vmem:[#allocation2 + $0x18] sm:$0xff] }
  0x4c   :  { %548 = vmatpush1.bf16.xpose.msra.mxu0 %v836_v25  ;;  %507 = vmatpush1.bf16.xpose.msra.mxu1 %v834_v35  ;;  %v101_v25 = vld [vmem:[#allocation5 + $0xf0] sm:$0xff]  ;;  %v86_v53 = vld [vmem:[#allocation5 + $0x78] sm:$0xff] }
  0x4d   :  { %549 = vmatprep.subr.bf16.mxu0 %v845_v26  ;;  %508 = vmatprep.subr.bf16.mxu1 %v843_v36  ;;  %v838_v26 = vcombine.low %v89_v19, %v93_v20  ;;  %v847_v27 = vcombine.high %v97_v24, %v101_v25  ;;  %v117_v35 = vld [vmem:[#allocation5 + $0x170] sm:$0xff]  ;;  %v854_v36 = vcombine.low %v105_v29, %v109_v30  ;;  %v90_v58 = vld [vmem:[#allocation5 + $0x98] sm:$0xff] }
  0x4e   :  { %v863_v37 = vcombine.high %v113_v34, %v117_v35  ;;  %v106_v2 = vld [vmem:[#allocation5 + $0x118] sm:$0xff] }
  0x4f   :  { %v110_v3 = vld [vmem:[#allocation5 + $0x138] sm:$0xff] }
  0x50   :  { %v114_v6 = vld [vmem:[#allocation5 + $0x158] sm:$0xff]  ;;  %v856_v10 = vcombine.low %v106_v2, %v110_v3 }
  0x51   :  { %v947_v12 = vld [vmem:[#allocation7 + $0x18] sm:$0xff]  }
  0x52   :  { %v122_v13 = vld [vmem:[#allocation5 + $0x198] sm:$0xff] }
  0x54   :  { %550 = vmatpush1.bf16.xpose.msra.mxu0 %v844_v31  ;;  %509 = vmatpush1.bf16.xpose.msra.mxu1 %v842_v43  ;;  %v846_v31 = vcombine.low %v97_v24, %v101_v25  ;;  %v133_v43 = vld [vmem:[#allocation5 + $0x1f0] sm:$0xff] }
  0x55   :  { %551 = vmatprep.subr.bf16.mxu0 %v853_v32  ;;  %510 = vmatprep.subr.bf16.mxu1 %v851_v44  ;;  %v855_v32 = vcombine.high %v105_v29, %v109_v30  ;;  %v879_v45 = vcombine.high %v129_v42, %v133_v43  ;;  %v951_v29 = vld [vmem:[#allocation7 + $0x38] sm:$0xff]   ;;  %v809_v30 = vld [vmem:[%s1184_s2] ss:$0 sm:$0xff] }
  0x5c   :  { %552 = vmatpush1.bf16.xpose.msra.mxu0 %v852_v39  ;;  %511 = vmatpush1.bf16.xpose.msra.mxu1 %v850_v51  ;;  %v125_v39 = vld [vmem:[#allocation5 + $0x1b0] sm:$0xff]  ;;  %v70_v51 = vld [vmem:[#allocation2 + $0x38] sm:$0xff] }
  0x5d   :  { %553 = vmatprep.subr.bf16.mxu0 %v861_v40  ;;  %512 = vmatprep.subr.bf16.mxu1 %v859_v52  ;;  %v862_v40 = vcombine.low %v113_v34, %v117_v35  ;;  %v871_v41 = vcombine.high %v121_v38, %v125_v39  ;;  %v870_v44 = vcombine.low %v121_v38, %v125_v39  ;;  %v82_v52 = vld [vmem:[#allocation5 + $0x58] sm:$0xff] }
  0x5e   :  { %v833_v57 = vcombine.high %v82_v52, %v86_v53 }
  0x64   :  { %554 = vmatpush1.bf16.xpose.msra.mxu0 %v860_v47  ;;  %513 = vmatpush1.bf16.xpose.msra.mxu1 %v858_v59  ;;  %v78_v47 = vld [vmem:[#allocation5 + $0x38] sm:$0xff] }
  0x65   :  { %555 = vmatprep.subr.bf16.mxu0 %v869_v48  ;;  %514 = vmatprep.subr.bf16.mxu1 %v867_v60  ;;  %v878_v48 = vcombine.low %v129_v42, %v133_v43  ;;  %v825_v49 = vcombine.high %v74_v46, %v78_v47  ;;  %v94_v59 = vld [vmem:[#allocation5 + $0xb8] sm:$0xff]  ;;  %v832_v60 = vcombine.low %v82_v52, %v86_v53 }
  0x66   :  { %v841_v61 = vcombine.high %v90_v58, %v94_v59 }
  0x6c   :  { %556 = vmatpush1.bf16.xpose.msra.mxu0 %v868_v55  ;;  %515 = vmatpush1.bf16.xpose.msra.mxu1 %v866_v5  ;;  %v824_v55 = vcombine.low %v74_v46, %v78_v47  ;;  %v857_v5 = vcombine.high %v106_v2, %v110_v3 }
  0x6d   :  { %557 = vmatprep.subr.bf16.mxu0 %v877_v56  ;;  %516 = vmatprep.subr.bf16.mxu1 %v875_v9  ;;  %v817_v56 = vcombine.high %v66_v50, %v70_v51  ;;  %v118_v9 = vld [vmem:[#allocation5 + $0x178] sm:$0xff] }
  0x6e   :  { %v865_v11 = vcombine.high %v114_v6, %v118_v9 }
  0x74   :  { %558 = vmatpush1.bf16.xpose.msra.mxu0 %v876_v63  ;;  %517 = vmatpush1.bf16.xpose.msra.mxu1 %v874_v18  ;;  %v102_v63 = vld [vmem:[#allocation5 + $0xf8] sm:$0xff] }
  0x75   :  { %584 = vmatprep.subr.bf16.mxu0 %v823_v0  ;;  %900 = vmatprep.subr.bf16.mxu1 %v1061_v22  ;;  %v840_v0 = vcombine.low %v90_v58, %v94_v59  ;;  %v849_v1 = vcombine.high %v98_v62, %v102_v63  ;;  %v848_v4 = vcombine.low %v98_v62, %v102_v63  ;;  %v134_v18 = vld [vmem:[#allocation5 + $0x1f8] sm:$0xff] }
  0x7b   :  { %576 = vmatmul.mubr.bf16.vlgmr.msra.gmra.mrb[0].mxu0 %v812_v14  ;;  %535 = vmatmul.mubr.bf16.vlgmr.msra.gmra.mrb[0].mxu1 %v810_v8  ;;  %v126_v14 = vld [vmem:[#allocation5 + $0x1b8] sm:$0xff]  ;;  %v948_v8 = vld [vmem:[#allocation7 + $0x20] sm:$0xff]  }
  0x7c   :  { %585 = vmatpush1.bf16.xpose.msra.mxu0 %v822_v15  ;;  %616 = vmatprep.mubr.bf16.mxu0 %v815_v16  ;;  %v864_v15 = vcombine.low %v114_v6, %v118_v9  ;;  %v873_v16 = vcombine.high %v122_v13, %v126_v14  ;;  %v872_v19 = vcombine.low %v122_v13, %v126_v14 }
  0x7d   :  { %586 = vmatprep.subr.bf16.mxu0 %v831_v17  ;;  %901 = vmatpush3.bf16.xpose.msra.mxu1 %v944_v23  ;;  %v130_v17 = vld [vmem:[#allocation5 + $0x1d8] sm:$0xff]  ;;  %v949_v23 = vld [vmem:[#allocation7 + $0x28] sm:$0xff]  }
  0x7e   :  { %902 = vmatprep.subr.bf16.mxu1 %v1061_v22  ;;  %v881_v20 = vcombine.high %v130_v17, %v134_v18  ;;  %916 = vmatprep.mubr.msk.bf16.mxu1 %vm1062_vm0, %v1061_v22 }
  0x84   :  { %587 = vmatpush1.bf16.xpose.msra.mxu0 %v830_v21  ;;  %v880_v21 = vcombine.low %v130_v17, %v134_v18 }
  0x85   :  { %588 = vmatprep.subr.bf16.mxu0 %v839_v7  ;;  %903 = vmatpush3.bf16.xpose.msra.mxu1 %v945_v28  ;;  %v816_v7 = vcombine.low %v66_v50, %v70_v51  ;;  %v950_v28 = vld [vmem:[#allocation7 + $0x30] sm:$0xff]  }
  0x86   :  { %904 = vmatprep.subr.bf16.mxu1 %v1061_v22 }
  0x8c   :  { %589 = vmatpush1.bf16.xpose.msra.mxu0 %v838_v26 }
  0x8d   :  { %590 = vmatprep.subr.bf16.mxu0 %v847_v27  ;;  %905 = vmatpush3.bf16.xpose.msra.mxu1 %v946_v33 }
  0x8e   :  { %906 = vmatprep.subr.bf16.mxu1 %v1061_v22 }
  0x94   :  { %591 = vmatpush1.bf16.xpose.msra.mxu0 %v846_v31 }
  0x95   :  { %592 = vmatprep.subr.bf16.mxu0 %v855_v32  ;;  %907 = vmatpush3.bf16.xpose.msra.mxu1 %v947_v12 }
  0x96   :  { %908 = vmatprep.subr.bf16.mxu1 %v1061_v22 }
  0x9c   :  { %593 = vmatpush1.bf16.xpose.msra.mxu0 %v854_v36 }
  0x9d   :  { %594 = vmatprep.subr.bf16.mxu0 %v863_v37  ;;  %909 = vmatpush3.bf16.xpose.msra.mxu1 %v948_v8 }
  0x9e   :  { %910 = vmatprep.subr.bf16.mxu1 %v1061_v22 }
  0xa4   :  { %595 = vmatpush1.bf16.xpose.msra.mxu0 %v862_v40 }
  0xa5   :  { %596 = vmatprep.subr.bf16.mxu0 %v871_v41  ;;  %911 = vmatpush3.bf16.xpose.msra.mxu1 %v949_v23 }
  0xa6   :  { %912 = vmatprep.subr.bf16.mxu1 %v1061_v22 }
  0xac   :  { %597 = vmatpush1.bf16.xpose.msra.mxu0 %v870_v44 }
  0xad   :  { %598 = vmatprep.subr.bf16.mxu0 %v879_v45  ;;  %913 = vmatpush3.bf16.xpose.msra.mxu1 %v950_v28 }
  0xae   :  { %914 = vmatprep.subr.bf16.mxu1 %v1061_v22 }
  0xb4   :  { %599 = vmatpush1.bf16.xpose.msra.mxu0 %v878_v48 }
  0xb5   :  { %625 = vmatprep.subr.bf16.mxu0 %v825_v49  ;;  %915 = vmatpush3.bf16.xpose.msra.mxu1 %v951_v29  ;;  %v882_v49 = vld [vmem:[%s1186_s4] ss:$0 sm:$0xff] }
  0xbb   :  { %617 = vmatmul.mubr.bf16.vlgmr.msra.gmra.mrb[0].mxu0 %v814_v54 }
  0xbc   :  { %626 = vmatpush1.bf16.xpose.msra.mxu0 %v824_v55  ;;  %657 = vmatprep.mubr.bf16.mxu0 %v817_v56 }
  0xbd   :  { %627 = vmatprep.subr.bf16.mxu0 %v833_v57 }
  0xc4   :  { %628 = vmatpush1.bf16.xpose.msra.mxu0 %v832_v60 }
  0xc5   :  { %629 = vmatprep.subr.bf16.mxu0 %v841_v61 }
  0xcc   :  { %630 = vmatpush1.bf16.xpose.msra.mxu0 %v840_v0 }
  0xcd   :  { %631 = vmatprep.subr.bf16.mxu0 %v849_v1 }
  0xd4   :  { %632 = vmatpush1.bf16.xpose.msra.mxu0 %v848_v4 }
  0xd5   :  { %633 = vmatprep.subr.bf16.mxu0 %v857_v5 }
  0xdc   :  { %634 = vmatpush1.bf16.xpose.msra.mxu0 %v856_v10 }
  0xdd   :  { %635 = vmatprep.subr.bf16.mxu0 %v865_v11 }
  0xe4   :  { %636 = vmatpush1.bf16.xpose.msra.mxu0 %v864_v15 }
  0xe5   :  { %637 = vmatprep.subr.bf16.mxu0 %v873_v16 }
  0xec   :  { %638 = vmatpush1.bf16.xpose.msra.mxu0 %v872_v19 }
  0xed   :  { %639 = vmatprep.subr.bf16.mxu0 %v881_v20 }
  0xf4   :  { %640 = vmatpush1.bf16.xpose.msra.mxu0 %v880_v21 }
  0xfb   :  { %658 = vmatmul.mubr.bf16.vlgmr.msra.gmra.mrb[0].mxu0 %v816_v7 }
 0x14e   :  { %v536_v24 = vpop.f32.mrb[0].mxu1 }
 0x14f   :  { %v538_v25 = vpop.f32.mrb[1].mxu1  ;;  %v537_v31 = vadd.f32 %v809_v30, %v536_v24 }
 0x150   :  { %v539_v26 = vpop.f32.mrb[2].mxu1 }
 0x151   :  { %v541_v27 = vpop.f32.mrb[3].mxu1  ;;  %v540_v33 = vadd.f32 %v809_v30, %v539_v26 }
 0x1ce   :  { %v659_v32 = vpop.f32.mrb[0].mxu0 }
 0x1cf   :  { %v921_v34 = vadd.f32 %v659_v32, %v537_v31  ;;  %v661_v35 = vpop.f32.mrb[1].mxu0 }
 0x1d0   :  { %v662_v36 = vpop.f32.mrb[2].mxu0 }
 0x1d1   :  { %v666_v37 = vsub.f32 0.0, %v921_v34  ;;  %v923_v38 = vadd.f32 %v662_v36, %v540_v33  ;;  %v664_v39 = vpop.f32.mrb[3].mxu0 }
 0x1d3   :  { %v668_v40 = vmul.f32 1.442695, %v666_v37  ;;  %v667_v41 = vsub.f32 0.0, %v923_v38 }
 0x1d5   :  { %952 = vpow2.f32 %v668_v40  ;;  %v670_v42 = vmul.f32 1.442695, %v667_v41 }
 0x1d7   :  { %954 = vpow2.f32 %v670_v42 }
 0x1df   :  { %v953_v22 = vpop.eup %952 }
 0x1e0   :  { %v672_v43 = vadd.f32 1.0, %v953_v22 }
 0x1e1   :  { %v955_v44 = vpop.eup %954 }
 0x1e2   :  { %v673_v45 = vadd.f32 1.0, %v955_v44  ;;  %956 = vrcp.f32 %v672_v43 }
 0x1e4   :  { %958 = vrcp.f32 %v673_v45 }
 0x1ec   :  { %v957_v46 = vpop.eup %956 }
 0x1ee   :  { %v959_v47 = vpop.eup %958 }
 0x1ef   :  { %v676_v48 = vpack.c.bf16 %v959_v47, %v957_v46 }
 0x1f1   :  { %917 = vmatmul.mubr.bf16.vlgmr.msra.gmra.mrb[4].mxu1 %v676_v48 }
 0x2c4   :  { %v782_v50 = vpop.f32.mrb[4].mxu1 }
 0x2c5   :  { %v783_v51 = vadd.f32 %v882_v49, %v782_v50  ;;  %v918_v52 = vpop.f32.mrb[5].mxu1 }
 0x2c6   :  { %v785_v53 = vpop.f32.mrb[6].mxu1 }
 0x2c7   :  { %789 = vst [vmem:[#allocation8] sm:$0xff] %v783_v51  ;;  %v786_v54 = vadd.f32 %v882_v49, %v785_v53  ;;  %v919_v55 = vpop.f32.mrb[7].mxu1 }
 0x2c9   :  { %790 = vst [vmem:[#allocation8 + $0x8] sm:$0xff] %v786_v54 }
 0x2ca   :  { %1037 = shalt.err (!%p1034_p0)
}
 0x2cb   :  { %s1038_s12 = scalar_lea.hbm %s1187_s5, 256 }
 0x2cc   :  { %p1039_p1 = scmp.ne.s32.totalorder %s1187_s5, %s1038_s12  ;;  %p1042_p2 = scmp.lt.u32.totalorder %s1038_s12, %s1187_s5 }
 0x2ce   :  { %p1044_p3 = pnand %p1042_p2, %p1039_p1 }
 0x2d0   :  { %1047 = shalt.err (!%p1044_p3)
}
 0x2d1   :  { %s1064_s1 = smov 128   ;;  %s1065_s17 = smov 8  }
 0x2d2   :  { %802 = dma.vmem_to_hbm [thread:$0]  %s797_s9, 256, %s1187_s5, [#allocation4], %s1064_s1, %s1064_s1, %s1065_s17  }
 0x2d3   :  { %1052 = dma.done.wait [#allocation4], 256  }
 0x2d4   :  { %1053 = vsyncadd [#allocation4], 4294967040 }
 0x2d5   :  { %806 = vsyncpa [#allocation3], 1 }
 0x2d6   :  { %807 = vsyncpa [#allocation6], 1 }
 0x2d7   :  { %808 = vsyncpa [#allocation4], 1 }

</bundles_post_ra>
